<compile_context>
chip_gen: v5e
topology: v5e:2x2
jax: 0.10.0
libtpu: 0.0.40
codegen_flags: <defaults>
</compile_context>

<pallas_src>
import math
import functools

import jax
import jax.numpy as jnp
import numpy as np
from jax.experimental import pallas as pl
from jax.experimental.pallas import tpu as pltpu

ACT_LIMIT = 10.0
LOG_STD_MIN = -10.0            # module: self.log_std_min = -10
LOG_STD_MAX = math.log(0.5)    # module: self.log_std_max = np.log(0.5)
EPS1 = 1.0 - 1e-4
_HALF_LOG_2PI = 0.5 * math.log(2.0 * math.pi)


def _round_up(x, m):
    return ((x + m - 1) // m) * m


def sac_forward_kernel(state_ref, noise_ref,
                       w1_ref, b1_ref, w2_ref, b2_ref, w3_ref, b3_ref,
                       wh_ref, bh_ref,
                       out_ref):
    """Fused actor forward. Output is a narrow (tb, out_w) slab, out_w = rnd8(A+1):
         out[:, :A]    = action
         out[:, A:A+1] = log_prob
         out[:, A+1:]  = 0
    """
    x = state_ref[...]

    # actor_base: 3 x (Linear + ReLU), f32 accumulation on the MXU.
    h = jnp.maximum(
        jnp.dot(x, w1_ref[...], preferred_element_type=jnp.float32) + b1_ref[...], 0.0)
    h = jnp.maximum(
        jnp.dot(h, w2_ref[...], preferred_element_type=jnp.float32) + b2_ref[...], 0.0)
    h = jnp.maximum(
        jnp.dot(h, w3_ref[...], preferred_element_type=jnp.float32) + b3_ref[...], 0.0)

    # Fused heads: one matmul produces [mean | log_std].
    y = jnp.dot(h, wh_ref[...], preferred_element_type=jnp.float32) + bh_ref[...]
    num_act = y.shape[-1] // 2
    mean = y[:, :num_act]
    log_std = jnp.clip(y[:, num_act:], LOG_STD_MIN, LOG_STD_MAX)  # StraightThroughClamp fwd
    std = jnp.exp(log_std)

    # Reparameterized sample (Gaussian noise supplied from outside for determinism).
    noise = noise_ref[...]
    action_t = noise * std + mean

    # Normal(0,1).log_prob((a_t - mean)/std).sum(-1) - log_std.sum(-1)
    # (a_t - mean)/std == noise exactly, so skip the subtract + divide round trip.
    log_prob = jnp.sum(-0.5 * noise * noise - _HALF_LOG_2PI - log_std,
                       axis=-1, keepdims=True)

    # to_box: tanh squash; log-det via the identity
    #   2*(log2 - atanh(a) - softplus(-2*atanh(a))) == log(1 - a^2)
    #                                               == log1p(a) + log1p(-a)
    a = jnp.clip(jnp.tanh(action_t), -EPS1, EPS1)
    ld = -jnp.sum(jnp.log1p(a) + jnp.log1p(-a), axis=-1, keepdims=True)
    ld = ld - math.log(ACT_LIMIT) * num_act
    action = ACT_LIMIT * a
    log_prob = log_prob + ld

    # Narrow packed output: zero the (tb, out_w) tile (out_w is only rnd8(A+1) wide
    # now, so this is cheap), then drop in the action / log_prob columns.
    out_ref[...] = jnp.zeros_like(out_ref)
    out_ref[:, :num_act] = action.astype(out_ref.dtype)
    out_ref[:, num_act:num_act + 1] = log_prob.astype(out_ref.dtype)


@functools.partial(jax.jit, static_argnames=("tb_cap",))
def mlp_sac_forward(state, noise, params, tb_cap=2048):
    """Fused MLPSAC forward (non-discrete, deterministic=False).

    Returns (action, log_prob, entropy, value) with shapes
    (B, A), (B, 1), (B, 1), (B, 1).
    """
    B, D = state.shape
    A = noise.shape[-1]
    H = params["w1"].shape[1]

    out_w = _round_up(A + 1, 8)  # narrow lane-dense packed output (>= A+1)

    # Batch tiling: one grid step up to tb_cap rows (optimal on single-TC v5e/v6e);
    # beyond that, tb_cap-row "parallel" tiles give >=2 grid steps (v7x megacore).
    # Arbitrary B is handled by zero-padding up to the tile multiple (padded rows
    # compute garbage that is sliced away below).
    Bp = _round_up(B, 8)
    if Bp <= tb_cap:
        tb = Bp
    else:
        tb = tb_cap
        Bp = _round_up(B, tb)
    if Bp != B:
        state = jnp.pad(state, ((0, Bp - B), (0, 0)))
        noise = jnp.pad(noise, ((0, Bp - B), (0, 0)))
    grid = (Bp // tb,)

    def batch_spec(shape):
        return pl.BlockSpec(shape, lambda i: (i, 0))

    def rep_spec(shape):
        # Grid-invariant operand (constant index_map); <10 KiB total at H=32.
        return pl.BlockSpec(shape, lambda i: (0, 0))

    in_specs = [
        batch_spec((tb, D)),                 # state
        batch_spec((tb, A)),                 # noise
        rep_spec((D, H)), rep_spec((1, H)),  # layer 1
        rep_spec((H, H)), rep_spec((1, H)),  # layer 2
        rep_spec((H, H)), rep_spec((1, H)),  # layer 3
        rep_spec((H, 2 * A)), rep_spec((1, 2 * A)),  # fused mean|log_std head
    ]
    out_specs = pl.BlockSpec((tb, out_w), lambda i: (i, 0))

    packed = pl.pallas_call(
        sac_forward_kernel,
        out_shape=jax.ShapeDtypeStruct((Bp, out_w), jnp.float32),
        grid_spec=pltpu.PrefetchScalarGridSpec(
            num_scalar_prefetch=0,
            grid=grid,
            in_specs=in_specs,
            out_specs=out_specs,
        ),
        compiler_params=pltpu.CompilerParams(
            dimension_semantics=("parallel",)),
    )(state, noise,
      params["w1"], params["b1"], params["w2"], params["b2"],
      params["w3"], params["b3"], params["wh"], params["bh"])

    action = packed[:B, :A]
    log_prob = packed[:B, A:A + 1]
    entropy = -log_prob                      # FlowDistribution.entropy()
    value = jnp.zeros((B, 1), jnp.float32)   # MLPSAC.get_value
    return action, log_prob, entropy, value


def init_params(key, num_inputs, num_outputs, hidden):
    """Parameter init mirroring the PyTorch module's shapes / init ranges.
    actor_base Linear layers: default uniform(-1/sqrt(fan_in), 1/sqrt(fan_in)).
    mean_linear / log_std_linear: weight ~ uniform(-0.003, 0.003), bias = 0.
    Weights are stored as (in, out) for the y = x @ W + b layout."""
    ks = jax.random.split(key, 8)

    def u(k, shape, bound):
        return jax.random.uniform(k, shape, jnp.float32, -bound, bound)

    b_in = 1.0 / math.sqrt(num_inputs)
    b_h = 1.0 / math.sqrt(hidden)
    init_w = 0.003
    return {
        "w1": u(ks[0], (num_inputs, hidden), b_in),
        "b1": u(ks[1], (1, hidden), b_in),
        "w2": u(ks[2], (hidden, hidden), b_h),
        "b2": u(ks[3], (1, hidden), b_h),
        "w3": u(ks[4], (hidden, hidden), b_h),
        "b3": u(ks[5], (1, hidden), b_h),
        "wm": u(ks[6], (hidden, num_outputs), init_w),
        "bm": jnp.zeros((1, num_outputs), jnp.float32),
        "ws": u(ks[7], (hidden, num_outputs), init_w),
        "bs": jnp.zeros((1, num_outputs), jnp.float32),
    }


def prepare_params(params):
    """One-time prep outside the per-call path: fuse the mean / log_std heads into a
    single (H, 2A) weight + (1, 2A) bias so the jitted forward does no concat."""
    p = dict(params)
    p["wh"] = jnp.concatenate([params["wm"], params["ws"]], axis=1)
    p["bh"] = jnp.concatenate([params["bm"], params["bs"]], axis=1)
    return p


def reference_forward(state, noise, params):
    """Pure-JAX reference matching the PyTorch semantics (atanh/softplus route)."""
    h = jnp.maximum(state @ params["w1"] + params["b1"], 0.0)
    h = jnp.maximum(h @ params["w2"] + params["b2"], 0.0)
    h = jnp.maximum(h @ params["w3"] + params["b3"], 0.0)
    mean = h @ params["wm"] + params["bm"]
    log_std = jnp.clip(h @ params["ws"] + params["bs"], LOG_STD_MIN, LOG_STD_MAX)
    std = jnp.exp(log_std)
    action_t = noise * std + mean
    z = (action_t - mean) / std
    logp = jnp.sum(-0.5 * z * z - 0.5 * math.log(2 * math.pi), -1) - jnp.sum(log_std, -1)
    a = jnp.clip(jnp.tanh(action_t), -EPS1, EPS1)
    a_t2 = jnp.arctanh(a)
    ld = -jnp.sum(2.0 * (math.log(2.0) - a_t2 - jax.nn.softplus(-2.0 * a_t2)), -1)
    ld = ld - math.log(ACT_LIMIT) * a.shape[1]
    return ACT_LIMIT * a, (logp + ld)[:, None]


def _check(B, D, H, A, seed):
    key = jax.random.PRNGKey(seed)
    k_params, k_state, k_noise = jax.random.split(key, 3)

    params = prepare_params(init_params(k_params, D, A, H))
    state = jax.random.normal(k_state, (B, D), jnp.float32)
    # TODO(synk): torch.randn in _sample has no in-kernel equivalent we want to
    # depend on for reproducibility; the Gaussian noise is passed in explicitly.
    noise = jax.random.normal(k_noise, (B, A), jnp.float32)

    action, log_prob, entropy, value = mlp_sac_forward(state, noise, params)
    jax.block_until_ready((action, log_prob, entropy, value))

    ref_action, ref_logp = reference_forward(state, noise, params)
    np.testing.assert_allclose(np.asarray(action), np.asarray(ref_action),
                               rtol=1e-4, atol=1e-4)
    np.testing.assert_allclose(np.asarray(log_prob), np.asarray(ref_logp),
                               rtol=1e-4, atol=1e-4)
    np.testing.assert_allclose(np.asarray(entropy), -np.asarray(ref_logp),
                               rtol=1e-4, atol=1e-4)
    assert value.shape == (B, 1)


if __name__ == "__main__":
    # batch, num_inputs, hidden_size_policy, num_outputs
    _check(B=16, D=32, H=32, A=4, seed=0)
    # Non-multiple-of-8 batch exercises the padding path (old version asserted out).
    _check(B=20, D=32, H=32, A=4, seed=1)
    print("KERNEL_OK")
</pallas_src>

<mosaic_0001>
module attributes {stable_mosaic.version = 11 : i64} {
  func.func @sac_forward_kernel(%arg0: i32, %arg1: memref<16x32xf32, #tpu.memory_space<vmem>>, %arg2: memref<16x4xf32, #tpu.memory_space<vmem>>, %arg3: memref<32x32xf32, #tpu.memory_space<vmem>>, %arg4: memref<1x32xf32, #tpu.memory_space<vmem>>, %arg5: memref<32x32xf32, #tpu.memory_space<vmem>>, %arg6: memref<1x32xf32, #tpu.memory_space<vmem>>, %arg7: memref<32x32xf32, #tpu.memory_space<vmem>>, %arg8: memref<1x32xf32, #tpu.memory_space<vmem>>, %arg9: memref<32x8xf32, #tpu.memory_space<vmem>>, %arg10: memref<1x8xf32, #tpu.memory_space<vmem>>, %arg11: memref<16x8xf32, #tpu.memory_space<vmem>>) attributes {dimension_semantics = [#tpu.dimension_semantics<parallel>], iteration_bounds = array<i64: 1>, scalar_prefetch = 0 : i64, scratch_operands = 0 : i64, tpu.core_type = #tpu.core_type<tc>, window_params = [{transform_indices = @transform_0, window_bounds = array<i64: 16, 32>}, {transform_indices = @transform_1, window_bounds = array<i64: 16, 4>}, {pipeline_mode = #tpu.pipeline_mode<synchronous>, transform_indices = @transform_2, window_bounds = array<i64: 32, 32>}, {pipeline_mode = #tpu.pipeline_mode<synchronous>, transform_indices = @transform_3, window_bounds = array<i64: 1, 32>}, {pipeline_mode = #tpu.pipeline_mode<synchronous>, transform_indices = @transform_4, window_bounds = array<i64: 32, 32>}, {pipeline_mode = #tpu.pipeline_mode<synchronous>, transform_indices = @transform_5, window_bounds = array<i64: 1, 32>}, {pipeline_mode = #tpu.pipeline_mode<synchronous>, transform_indices = @transform_6, window_bounds = array<i64: 32, 32>}, {pipeline_mode = #tpu.pipeline_mode<synchronous>, transform_indices = @transform_7, window_bounds = array<i64: 1, 32>}, {pipeline_mode = #tpu.pipeline_mode<synchronous>, transform_indices = @transform_8, window_bounds = array<i64: 32, 8>}, {pipeline_mode = #tpu.pipeline_mode<synchronous>, transform_indices = @transform_9, window_bounds = array<i64: 1, 8>}, {transform_indices = @transform_10, window_bounds = array<i64: 16, 8>}]} {
    %c0 = arith.constant 0 : index
    %c0_0 = arith.constant 0 : index
    %0 = vector.load %arg1[%c0, %c0_0] : memref<16x32xf32, #tpu.memory_space<vmem>>, vector<16x32xf32>
    %c0_1 = arith.constant 0 : index
    %c0_2 = arith.constant 0 : index
    %1 = vector.load %arg3[%c0_1, %c0_2] : memref<32x32xf32, #tpu.memory_space<vmem>>, vector<32x32xf32>
    %cst = arith.constant dense<0.000000e+00> : vector<16x32xf32>
    %2 = tpu.matmul %0, %1, %cst {dimension_numbers = #tpu.dot_dimension_numbers<[1], [0], [0], [1], [0, 0, 1, 1], [], []>} : vector<16x32xf32>, vector<32x32xf32>, vector<16x32xf32> -> vector<16x32xf32>
    %c0_3 = arith.constant 0 : index
    %c0_4 = arith.constant 0 : index
    %3 = vector.load %arg4[%c0_3, %c0_4] : memref<1x32xf32, #tpu.memory_space<vmem>>, vector<1x32xf32>
    %4 = vector.broadcast %3 : vector<1x32xf32> to vector<16x32xf32>
    %5 = arith.addf %2, %4 : vector<16x32xf32>
    %cst_5 = arith.constant 0.000000e+00 : f32
    %6 = vector.broadcast %cst_5 : f32 to vector<16x32xf32>
    %7 = arith.maximumf %5, %6 : vector<16x32xf32>
    %c0_6 = arith.constant 0 : index
    %c0_7 = arith.constant 0 : index
    %8 = vector.load %arg5[%c0_6, %c0_7] : memref<32x32xf32, #tpu.memory_space<vmem>>, vector<32x32xf32>
    %cst_8 = arith.constant dense<0.000000e+00> : vector<16x32xf32>
    %9 = tpu.matmul %7, %8, %cst_8 {dimension_numbers = #tpu.dot_dimension_numbers<[1], [0], [0], [1], [0, 0, 1, 1], [], []>} : vector<16x32xf32>, vector<32x32xf32>, vector<16x32xf32> -> vector<16x32xf32>
    %c0_9 = arith.constant 0 : index
    %c0_10 = arith.constant 0 : index
    %10 = vector.load %arg6[%c0_9, %c0_10] : memref<1x32xf32, #tpu.memory_space<vmem>>, vector<1x32xf32>
    %11 = vector.broadcast %10 : vector<1x32xf32> to vector<16x32xf32>
    %12 = arith.addf %9, %11 : vector<16x32xf32>
    %cst_11 = arith.constant 0.000000e+00 : f32
    %13 = vector.broadcast %cst_11 : f32 to vector<16x32xf32>
    %14 = arith.maximumf %12, %13 : vector<16x32xf32>
    %c0_12 = arith.constant 0 : index
    %c0_13 = arith.constant 0 : index
    %15 = vector.load %arg7[%c0_12, %c0_13] : memref<32x32xf32, #tpu.memory_space<vmem>>, vector<32x32xf32>
    %cst_14 = arith.constant dense<0.000000e+00> : vector<16x32xf32>
    %16 = tpu.matmul %14, %15, %cst_14 {dimension_numbers = #tpu.dot_dimension_numbers<[1], [0], [0], [1], [0, 0, 1, 1], [], []>} : vector<16x32xf32>, vector<32x32xf32>, vector<16x32xf32> -> vector<16x32xf32>
    %c0_15 = arith.constant 0 : index
    %c0_16 = arith.constant 0 : index
    %17 = vector.load %arg8[%c0_15, %c0_16] : memref<1x32xf32, #tpu.memory_space<vmem>>, vector<1x32xf32>
    %18 = vector.broadcast %17 : vector<1x32xf32> to vector<16x32xf32>
    %19 = arith.addf %16, %18 : vector<16x32xf32>
    %cst_17 = arith.constant 0.000000e+00 : f32
    %20 = vector.broadcast %cst_17 : f32 to vector<16x32xf32>
    %21 = arith.maximumf %19, %20 : vector<16x32xf32>
    %c0_18 = arith.constant 0 : index
    %c0_19 = arith.constant 0 : index
    %22 = vector.load %arg9[%c0_18, %c0_19] : memref<32x8xf32, #tpu.memory_space<vmem>>, vector<32x8xf32>
    %cst_20 = arith.constant dense<0.000000e+00> : vector<16x8xf32>
    %23 = tpu.matmul %21, %22, %cst_20 {dimension_numbers = #tpu.dot_dimension_numbers<[1], [0], [0], [1], [0, 0, 1, 1], [], []>} : vector<16x32xf32>, vector<32x8xf32>, vector<16x8xf32> -> vector<16x8xf32>
    %c0_21 = arith.constant 0 : index
    %c0_22 = arith.constant 0 : index
    %24 = vector.load %arg10[%c0_21, %c0_22] : memref<1x8xf32, #tpu.memory_space<vmem>>, vector<1x8xf32>
    %25 = vector.broadcast %24 : vector<1x8xf32> to vector<16x8xf32>
    %26 = arith.addf %23, %25 : vector<16x8xf32>
    %27 = vector.extract_strided_slice %26 {offsets = [0, 0], sizes = [16, 4], strides = [1, 1]} : vector<16x8xf32> to vector<16x4xf32>
    %28 = vector.extract_strided_slice %26 {offsets = [0, 4], sizes = [16, 4], strides = [1, 1]} : vector<16x8xf32> to vector<16x4xf32>
    %cst_23 = arith.constant -1.000000e+01 : f32
    %cst_24 = arith.constant -0.693147182 : f32
    %29 = vector.broadcast %cst_23 : f32 to vector<16x4xf32>
    %30 = arith.maximumf %29, %28 : vector<16x4xf32>
    %31 = vector.broadcast %cst_24 : f32 to vector<16x4xf32>
    %32 = arith.minimumf %31, %30 : vector<16x4xf32>
    %33 = math.exp %32 : vector<16x4xf32>
    %c0_25 = arith.constant 0 : index
    %c0_26 = arith.constant 0 : index
    %34 = vector.load %arg2[%c0_25, %c0_26] : memref<16x4xf32, #tpu.memory_space<vmem>>, vector<16x4xf32>
    %35 = arith.mulf %34, %33 : vector<16x4xf32>
    %36 = arith.addf %35, %27 : vector<16x4xf32>
    %cst_27 = arith.constant -5.000000e-01 : f32
    %37 = vector.broadcast %cst_27 : f32 to vector<16x4xf32>
    %38 = arith.mulf %37, %34 : vector<16x4xf32>
    %39 = arith.mulf %38, %34 : vector<16x4xf32>
    %cst_28 = arith.constant 0.918938517 : f32
    %40 = vector.broadcast %cst_28 : f32 to vector<16x4xf32>
    %41 = arith.subf %39, %40 : vector<16x4xf32>
    %42 = arith.subf %41, %32 : vector<16x4xf32>
    %cst_29 = arith.constant dense<0.000000e+00> : vector<16xf32>
    %43 = vector.multi_reduction <add>, %42, %cst_29 [1] : vector<16x4xf32> to vector<16xf32>
    %44 = vector.shape_cast %43 : vector<16xf32> to vector<16x1xf32>
    %45 = math.tanh %36 : vector<16x4xf32>
    %cst_30 = arith.constant -0.999899983 : f32
    %cst_31 = arith.constant 0.999899983 : f32
    %46 = vector.broadcast %cst_30 : f32 to vector<16x4xf32>
    %47 = arith.maximumf %46, %45 : vector<16x4xf32>
    %48 = vector.broadcast %cst_31 : f32 to vector<16x4xf32>
    %49 = arith.minimumf %48, %47 : vector<16x4xf32>
    %50 = math.log1p %49 : vector<16x4xf32>
    %cst_32 = arith.constant 0.000000e+00 : f32
    %51 = vector.broadcast %cst_32 : f32 to vector<16x4xf32>
    %52 = arith.subf %51, %49 : vector<16x4xf32>
    %53 = math.log1p %52 : vector<16x4xf32>
    %54 = arith.addf %50, %53 : vector<16x4xf32>
    %cst_33 = arith.constant dense<0.000000e+00> : vector<16xf32>
    %55 = vector.multi_reduction <add>, %54, %cst_33 [1] : vector<16x4xf32> to vector<16xf32>
    %56 = vector.shape_cast %55 : vector<16xf32> to vector<16x1xf32>
    %cst_34 = arith.constant 0.000000e+00 : f32
    %57 = vector.broadcast %cst_34 : f32 to vector<16x1xf32>
    %58 = arith.subf %57, %56 : vector<16x1xf32>
    %cst_35 = arith.constant 9.21034049 : f32
    %59 = vector.broadcast %cst_35 : f32 to vector<16x1xf32>
    %60 = arith.subf %58, %59 : vector<16x1xf32>
    %cst_36 = arith.constant 1.000000e+01 : f32
    %61 = vector.broadcast %cst_36 : f32 to vector<16x4xf32>
    %62 = arith.mulf %61, %49 : vector<16x4xf32>
    %63 = arith.addf %44, %60 : vector<16x1xf32>
    %cst_37 = arith.constant 0.000000e+00 : f32
    %64 = vector.broadcast %cst_37 : f32 to vector<16x8xf32>
    %c0_38 = arith.constant 0 : index
    %c0_39 = arith.constant 0 : index
    %65 = vector.load %arg11[%c0_38, %c0_39] : memref<16x8xf32, #tpu.memory_space<vmem>>, vector<16x8xf32>
    tpu.vector_store %arg11[%c0_38, %c0_39], %64 {strides = array<i32>} : memref<16x8xf32, #tpu.memory_space<vmem>>, vector<16x8xf32>,
    %c0_40 = arith.constant 0 : index
    %c0_41 = arith.constant 0 : index
    %66 = vector.load %arg11[%c0_40, %c0_41] : memref<16x8xf32, #tpu.memory_space<vmem>>, vector<16x4xf32>
    tpu.vector_store %arg11[%c0_40, %c0_41], %62 {strides = array<i32>} : memref<16x8xf32, #tpu.memory_space<vmem>>, vector<16x4xf32>,
    %c0_42 = arith.constant 0 : index
    %c4 = arith.constant 4 : index
    %67 = vector.load %arg11[%c0_42, %c4] : memref<16x8xf32, #tpu.memory_space<vmem>>, vector<16x1xf32>
    tpu.vector_store %arg11[%c0_42, %c4], %63 {strides = array<i32>} : memref<16x8xf32, #tpu.memory_space<vmem>>, vector<16x1xf32>,
    return
  }
  func.func @transform_0(%arg0: i32) -> (i32, i32) {
    %c0_i32 = arith.constant 0 : i32
    %c0_i32_0 = arith.constant 0 : i32
    return %arg0, %c0_i32 : i32, i32
  }
  func.func @transform_1(%arg0: i32) -> (i32, i32) {
    %c0_i32 = arith.constant 0 : i32
    %c0_i32_0 = arith.constant 0 : i32
    return %arg0, %c0_i32 : i32, i32
  }
  func.func @transform_2(%arg0: i32) -> (i32, i32) {
    %c0_i32 = arith.constant 0 : i32
    %c0_i32_0 = arith.constant 0 : i32
    %c0_i32_1 = arith.constant 0 : i32
    return %c0_i32, %c0_i32_0 : i32, i32
  }
  func.func @transform_3(%arg0: i32) -> (i32, i32) {
    %c0_i32 = arith.constant 0 : i32
    %c0_i32_0 = arith.constant 0 : i32
    %c0_i32_1 = arith.constant 0 : i32
    return %c0_i32, %c0_i32_0 : i32, i32
  }
  func.func @transform_4(%arg0: i32) -> (i32, i32) {
    %c0_i32 = arith.constant 0 : i32
    %c0_i32_0 = arith.constant 0 : i32
    %c0_i32_1 = arith.constant 0 : i32
    return %c0_i32, %c0_i32_0 : i32, i32
  }
  func.func @transform_5(%arg0: i32) -> (i32, i32) {
    %c0_i32 = arith.constant 0 : i32
    %c0_i32_0 = arith.constant 0 : i32
    %c0_i32_1 = arith.constant 0 : i32
    return %c0_i32, %c0_i32_0 : i32, i32
  }
  func.func @transform_6(%arg0: i32) -> (i32, i32) {
    %c0_i32 = arith.constant 0 : i32
    %c0_i32_0 = arith.constant 0 : i32
    %c0_i32_1 = arith.constant 0 : i32
    return %c0_i32, %c0_i32_0 : i32, i32
  }
  func.func @transform_7(%arg0: i32) -> (i32, i32) {
    %c0_i32 = arith.constant 0 : i32
    %c0_i32_0 = arith.constant 0 : i32
    %c0_i32_1 = arith.constant 0 : i32
    return %c0_i32, %c0_i32_0 : i32, i32
  }
  func.func @transform_8(%arg0: i32) -> (i32, i32) {
    %c0_i32 = arith.constant 0 : i32
    %c0_i32_0 = arith.constant 0 : i32
    %c0_i32_1 = arith.constant 0 : i32
    return %c0_i32, %c0_i32_0 : i32, i32
  }
  func.func @transform_9(%arg0: i32) -> (i32, i32) {
    %c0_i32 = arith.constant 0 : i32
    %c0_i32_0 = arith.constant 0 : i32
    %c0_i32_1 = arith.constant 0 : i32
    return %c0_i32, %c0_i32_0 : i32, i32
  }
  func.func @transform_10(%arg0: i32) -> (i32, i32) {
    %c0_i32 = arith.constant 0 : i32
    %c0_i32_0 = arith.constant 0 : i32
    return %arg0, %c0_i32 : i32, i32
  }
}

</mosaic_0001>

<bundles_post_ra>
// kernel: mlp_sac_forward.1
= control target key start
LH: loop header
LB: loop body
LE: loop exit
PB: predicated region body
PF: predicated region fallthrough
CT: control target
= control target key end

     0   :  { %15 = vsyncpa [#allocation3], 0  ;;  %s582_s0 = inlined_call_operand.vmem [shape: f32[16,32], index: 0, kind: input, shape index: {}]   ;;  %s583_s1 = inlined_call_operand.vmem [shape: f32[16,4], index: 1, kind: input, shape index: {}]   ;;  %s584_s2 = inlined_call_operand.vmem [shape: f32[32,32], index: 2, kind: input, shape index: {}]   ;;  %s585_s3 = inlined_call_operand.vmem [shape: f32[1,32], index: 3, kind: input, shape index: {}]   ;;  %s586_s4 = inlined_call_operand.hbm [shape: f32[32,32], index: 4, kind: input, shape index: {}]   ;;  %s587_s5 = inlined_call_operand.vmem [shape: f32[1,32], index: 5, kind: input, shape index: {}]   ;;  %s588_s6 = inlined_call_operand.hbm [shape: f32[32,32], index: 6, kind: input, shape index: {}]   ;;  %s589_s7 = inlined_call_operand.vmem [shape: f32[1,32], index: 7, kind: input, shape index: {}]   ;;  %s590_s8 = inlined_call_operand.vmem [shape: f32[32,8], index: 8, kind: input, shape index: {}]   ;;  %s591_s9 = inlined_call_operand.vmem [shape: f32[1,8], index: 9, kind: input, shape index: {}]   ;;  %s592_s10 = inlined_call_operand.vmem [shape: f32[16,8], index: 10, kind: output, shape index: {}]  }
   0x1   :  { %s29_s15 = sshll.u32 %s586_s4, 4  ;;  %s30_s15 = int_to_ptr.hbm [resolvable:$true] %s29_s15 }
   0x2   :  { %16 = vsyncpa [#allocation5], 0  ;;  %s435_s16 = smov [#allocation2]   ;;  %s44_s20 = sshll.u32 %s588_s6, 4  ;;  %s45_s20 = int_to_ptr.hbm [resolvable:$true] %s44_s20 }
   0x3   :  { %s31_s17 = sshll.u32 %s435_s16, 4  ;;  %s436_s21 = smov 128   ;;  %s32_s17 = int_to_ptr.vmem [resolvable:$true] %s31_s17 }
   0x4   :  { %s437_s22 = smov 8   ;;  %s438_s23 = smov [#allocation4]  }
   0x5   :  { %37 = dma.hbm_to_vmem [thread:$0]  %s30_s15, 512, %s32_s17, [#allocation3], %s436_s21, %s436_s21, %s437_s22  }
   0x6   :  { %s46_s24 = sshll.u32 %s438_s23, 4  ;;  %s47_s24 = int_to_ptr.vmem [resolvable:$true] %s46_s24 }
   0x7   :  { %52 = dma.hbm_to_vmem [thread:$0]  %s45_s20, 512, %s47_s24, [#allocation5], %s436_s21, %s436_s21, %s437_s22  }
   0x8   :  { %431 = dma.done.wait [#allocation3], 512  }
   0x9   :  { %432 = vsyncadd [#allocation3], 4294966784 }
   0xa   :  { %433 = dma.done.wait [#allocation5], 512  }
   0xb   :  { %434 = vsyncadd [#allocation5], 4294966784  ;;  %v72_v0 = vld [vmem:[%s584_s2 + $0x18] sm:$0xff]  ;;  %v71_v1 = vld [vmem:[%s584_s2 + $0x10] sm:$0xff]  ;;  %vm77_vm0 = vcmask 261120   ;;  %vm329_vm1 = vcmask 64512  }
   0xc   :  { %96 = vmatpush.msra.mxu0 %v72_v0  ;;  %v70_v2 = vld [vmem:[%s584_s2 + $0x8] sm:$0xff]  ;;  %v112_v3 = vld [vmem:[#allocation2 + $0x18] sm:$0xff]  ;;  %v69_v4 = vld [vmem:[%s584_s2] sm:$0xff]  ;;  %v440_v55 = vmov 0.0   ;;  %vm262_vm2 = vcmask 31744   ;;  %vm334_vm7 = vcmask 39968  }
   0xd   :  { %135 = vmatpush.msra.mxu1 %v112_v3  ;;  %v67_v5 = vld [vmem:[%s582_s0] sm:$0xff]  ;;  %v68_v6 = vld [vmem:[%s582_s0 + $0x8] sm:$0xff]  ;;  %v111_v7 = vld [vmem:[#allocation2 + $0x10] sm:$0xff]  ;;  %330 = vst.msk [vmem:[%s592_s10] sm:$0xff] %vm329_vm1, %v440_v55 }
   0xe   :  { %97 = vmatpush.msra.mxu0 %v71_v1  ;;  %v110_v8 = vld [vmem:[#allocation2 + $0x8] sm:$0xff]  ;;  %v109_v9 = vld [vmem:[#allocation2] sm:$0xff]  ;;  %v151_v10 = vld [vmem:[#allocation4 + $0x18] sm:$0xff]  ;;  %331 = vst.msk [vmem:[%s592_s10 + $0x8] sm:$0xff] %vm329_vm1, %v440_v55 }
   0xf   :  { %136 = vmatpush.msra.mxu1 %v111_v7  ;;  %174 = vmatpush.msra.mxu2 %v151_v10  ;;  %v363_v11 = vld [vmem:[%s585_s3] ss:$0 sm:$0xff]  ;;  %v150_v18 = vld [vmem:[#allocation4 + $0x10] sm:$0xff]  ;;  %v149_v19 = vld [vmem:[#allocation4 + $0x8] sm:$0xff] }
  0x10   :  { %98 = vmatpush.msra.mxu0 %v70_v2  ;;  %v148_v20 = vld [vmem:[#allocation4] sm:$0xff]  ;;  %v190_v21 = vld [vmem:[%s590_s8 + $0x18] sm:$0xff]  ;;  %v189_v29 = vld [vmem:[%s590_s8 + $0x10] sm:$0xff] }
  0x11   :  { %137 = vmatpush.msra.mxu1 %v110_v8  ;;  %175 = vmatpush.msra.mxu2 %v150_v18  ;;  %v364_v22 = vld [vmem:[%s587_s5] ss:$0 sm:$0xff]  ;;  %v188_v30 = vld [vmem:[%s590_s8 + $0x8] sm:$0xff] }
  0x12   :  { %99 = vmatpush.msra.mxu0 %v69_v4  ;;  %213 = vmatpush.msra.mxu3 %v190_v21  ;;  %v187_v31 = vld [vmem:[%s590_s8] sm:$0xff]  ;;  %s439_s8 = smov 124   ;;  %v233_v56 = vld [vmem:[%s583_s1 + $0x8] sm:$0xff] }
  0x13   :  { %343 = vmatmul.msk.f32.vlgmr.msra.gmra.mxu0 %vm77_vm0, %v67_v5  ;;  %138 = vmatpush.msra.mxu1 %v109_v9  ;;  %v365_v32 = vld [vmem:[%s589_s7] ss:$0 sm:$0xff]  ;;  %v247_v58 = vmul.f32 -0.5, %v233_v56 }
  0x14   :  { %176 = vmatpush.msra.mxu2 %v149_v19  ;;  %214 = vmatpush.msra.mxu3 %v189_v29  ;;  %v366_v39 = vld [vmem:[%s591_s9] ss:$0 sm:$0xff] }
  0x15   :  { %v232_v52 = vld [vmem:[%s583_s1] sm:$0xff]  ;;  %v249_v61 = vmul.f32 %v247_v58, %v233_v56 }
  0x16   :  { %177 = vmatpush.msra.mxu2 %v148_v20  ;;  %215 = vmatpush.msra.mxu3 %v188_v30  ;;  %v246_v53 = vmul.f32 -0.5, %v232_v52 }
  0x17   :  { %v352_v63 = vadd.f32 -0.9189385, %v249_v61 }
  0x18   :  { %216 = vmatpush.msra.mxu3 %v187_v31  ;;  %v248_v54 = vmul.f32 %v246_v53, %v232_v52 }
  0x1a   :  { %v351_v57 = vadd.f32 -0.9189385, %v248_v54 }
  0x1b   :  { %344 = vmatmul.msk.f32.gmra.mxu0 %vm77_vm0, %v68_v6 }
  0x90   :  { %v101_v12 = vpop.f32.mrf.mxu0 }
  0x91   :  { %v102_v13 = vadd.f32 %v363_v11, %v101_v12 }
  0x93   :  { %v107_v14 = vmax.f32 %v102_v13, 0.0 }
  0x95   :  { %345 = vmatmul.msk.f32.vlgmr.msra.gmra.mxu1 %vm77_vm0, %v107_v14 }
  0x98   :  { %v104_v15 = vpop.f32.mrf.mxu0 }
  0x99   :  { %v105_v16 = vadd.f32 %v363_v11, %v104_v15 }
  0x9b   :  { %v108_v17 = vmax.f32 %v105_v16, 0.0 }
  0x9d   :  { %346 = vmatmul.msk.f32.gmra.mxu1 %vm77_vm0, %v108_v17 }
 0x112   :  { %v140_v23 = vpop.f32.mrf.mxu1 }
 0x113   :  { %v141_v24 = vadd.f32 %v364_v22, %v140_v23 }
 0x115   :  { %v146_v25 = vmax.f32 %v141_v24, 0.0 }
 0x117   :  { %347 = vmatmul.msk.f32.vlgmr.msra.gmra.mxu2 %vm77_vm0, %v146_v25 }
 0x11a   :  { %v143_v26 = vpop.f32.mrf.mxu1 }
 0x11b   :  { %v144_v27 = vadd.f32 %v364_v22, %v143_v26 }
 0x11d   :  { %v147_v28 = vmax.f32 %v144_v27, 0.0 }
 0x11f   :  { %348 = vmatmul.msk.f32.gmra.mxu2 %vm77_vm0, %v147_v28 }
 0x19a   :  { %v179_v33 = vpop.f32.mrf.mxu2 }
 0x19b   :  { %v180_v34 = vadd.f32 %v365_v32, %v179_v33 }
 0x19d   :  { %v185_v35 = vmax.f32 %v180_v34, 0.0 }
 0x19f   :  { %349 = vmatmul.msk.f32.vlgmr.msra.gmra.mxu3 %vm77_vm0, %v185_v35 }
 0x1a2   :  { %v182_v36 = vpop.f32.mrf.mxu2 }
 0x1a3   :  { %v183_v37 = vadd.f32 %v365_v32, %v182_v36 }
 0x1a5   :  { %v186_v38 = vmax.f32 %v183_v37, 0.0 }
 0x1a7   :  { %350 = vmatmul.msk.f32.gmra.mxu3 %vm77_vm0, %v186_v38 }
 0x222   :  { %v218_v40 = vpop.f32.mrf.mxu3 }
 0x223   :  { %v219_v41 = vadd.f32 %v366_v39, %v218_v40 }
 0x225   :  { %v224_v42 = vmax.f32 %v219_v41, -10.0 }
 0x227   :  { %v226_v43 = vmin.f32 %v224_v42, -0.6931472 }
 0x229   :  { %254 = vrot.lane.b32.xlu1 %v226_v43, %s439_s8  ;;  %v228_v44 = vmul.f32 1.442695, %v226_v43 }
 0x22a   :  { %v221_v45 = vpop.f32.mrf.mxu3 }
 0x22b   :  { %367 = vpow2.f32 %v228_v44  ;;  %v222_v46 = vadd.f32 %v366_v39, %v221_v45 }
 0x22d   :  { %v225_v47 = vmax.f32 %v222_v46, -10.0 }
 0x22f   :  { %v227_v48 = vmin.f32 %v225_v47, -0.6931472 }
 0x231   :  { %v368_v49 = vpop.eup %367  ;;  %v230_v50 = vmul.f32 1.442695, %v227_v48  ;;  %256 = vrot.lane.b32.xlu1 %v227_v48, %s439_s8 }
 0x232   :  { %236 = vrot.lane.b32.xlu0 %v368_v49, %s439_s8 }
 0x233   :  { %369 = vpow2.f32 %v230_v50 }
 0x239   :  { %v370_v51 = vpop.eup %369 }
 0x23a   :  { %238 = vrot.lane.b32.xlu0 %v370_v51, %s439_s8 }
 0x29b   :  { %v255_v59 = vpop.permute.xlu1 %254 }
 0x29c   :  { %v260_v60 = vsub.f32 %v351_v57, %v255_v59 }
 0x29e   :  { %v263_v62 = vsel %vm262_vm2, %v260_v60, 0.0 }
 0x29f   :  { %264 = vadd.xlane.f32.xlu0 %v263_v62 }
 0x2a3   :  { %v257_v0 = vpop.permute.xlu1 %256 }
 0x2a4   :  { %v261_v1 = vsub.f32 %v352_v63, %v257_v0  ;;  %v237_v2 = vpop.permute.xlu0 %236 }
 0x2a5   :  { %v242_v3 = vmul.f32 %v237_v2, %v232_v52 }
 0x2a6   :  { %v266_v4 = vsel %vm262_vm2, %v261_v1, 0.0 }
 0x2a7   :  { %v244_v5 = vadd.f32 %v242_v3, %v219_v41  ;;  %267 = vadd.xlane.f32.xlu1 %v266_v4 }
 0x2a9   :  { %371 = vtanh.f32 %v244_v5 }
 0x2ac   :  { %v239_v6 = vpop.permute.xlu0 %238 }
 0x2ad   :  { %v243_v7 = vmul.f32 %v239_v6, %v233_v56 }
 0x2af   :  { %v372_v8 = vpop.eup %371  ;;  %v245_v9 = vadd.f32 %v243_v7, %v222_v46 }
 0x2b0   :  { %v353_v10 = vclamps-f32 %v372_v8, 0.9999 }
 0x2b1   :  { %373 = vtanh.f32 %v245_v9 }
 0x2b2   :  { %v325_v11 = vmul.f32 10.0, %v353_v10  ;;  %v275_v12 = vadd.f32 1.0, %v353_v10  ;;  %v293_v13 = vsub.f32 0.0, %v353_v10  ;;  %v278_v15 = vmul.f32 -0.5, %v353_v10 }
 0x2b3   :  { %v281_v24 = vand.u32 2147483647, %v353_v10 }
 0x2b4   :  { %375 = vlog2.f32 %v275_v12  ;;  %332 = vst.msk [vmem:[%s592_s10] sm:$0xff] %vm262_vm2, %v325_v11  ;;  %v295_v14 = vadd.f32 1.0, %v293_v13  ;;  %v298_v16 = vmul.f32 -0.5, %v293_v13  ;;  %v279_v20 = vadd.f32 1.0, %v278_v15 }
 0x2b5   :  { %v301_v25 = vand.u32 2147483647, %v293_v13  ;;  %vm282_vm3 = vcmp.lt.f32.partialorder %v281_v24, 0.0004427343 }
 0x2b6   :  { %377 = vlog2.f32 %v295_v14  ;;  %v299_v21 = vadd.f32 1.0, %v298_v16  ;;  %v280_v32 = vmul.f32 %v353_v10, %v279_v20 }
 0x2b7   :  { %v374_v17 = vpop.eup %373  ;;  %vm302_vm4 = vcmp.lt.f32.partialorder %v301_v25, 0.0004427343 }
 0x2b8   :  { %v354_v18 = vclamps-f32 %v374_v17, 0.9999  ;;  %v300_v34 = vmul.f32 %v299_v21, %v293_v13 }
 0x2ba   :  { %v376_v19 = vpop.eup %375  ;;  %v284_v22 = vadd.f32 1.0, %v354_v18  ;;  %v294_v23 = vsub.f32 0.0, %v354_v18  ;;  %v326_v26 = vmul.f32 10.0, %v354_v18  ;;  %v287_v30 = vmul.f32 -0.5, %v354_v18 }
 0x2bb   :  { %v277_v27 = vmul.f32 0.6931472, %v376_v19  ;;  %v290_v41 = vand.u32 2147483647, %v354_v18 }
 0x2bc   :  { %379 = vlog2.f32 %v284_v22  ;;  %v304_v28 = vadd.f32 1.0, %v294_v23  ;;  %v378_v29 = vpop.eup %377  ;;  %v307_v31 = vmul.f32 -0.5, %v294_v23  ;;  %333 = vst.msk [vmem:[%s592_s10 + $0x8] sm:$0xff] %vm262_vm2, %v326_v26  ;;  %v288_v38 = vadd.f32 1.0, %v287_v30 }
 0x2bd   :  { %v297_v33 = vmul.f32 0.6931472, %v378_v29  ;;  %v283_v35 = vsel %vm282_vm3, %v280_v32, %v277_v27  ;;  %v310_v42 = vand.u32 2147483647, %v294_v23  ;;  %vm291_vm5 = vcmp.lt.f32.partialorder %v290_v41, 0.0004427343 }
 0x2be   :  { %381 = vlog2.f32 %v304_v28  ;;  %v308_v39 = vadd.f32 1.0, %v307_v31  ;;  %v289_v46 = vmul.f32 %v354_v18, %v288_v38 }
 0x2bf   :  { %v303_v36 = vsel %vm302_vm4, %v300_v34, %v297_v33  ;;  %vm311_vm6 = vcmp.lt.f32.partialorder %v310_v42, 0.0004427343 }
 0x2c0   :  { %v313_v37 = vadd.f32 %v303_v36, %v283_v35  ;;  %v309_v48 = vmul.f32 %v308_v39, %v294_v23 }
 0x2c2   :  { %v380_v40 = vpop.eup %379  ;;  %v315_v43 = vsel %vm262_vm2, %v313_v37, 0.0 }
 0x2c3   :  { %v286_v44 = vmul.f32 0.6931472, %v380_v40  ;;  %316 = vadd.xlane.f32.xlu2 %v315_v43 }
 0x2c4   :  { %v382_v45 = vpop.eup %381 }
 0x2c5   :  { %v306_v47 = vmul.f32 0.6931472, %v382_v45  ;;  %v292_v49 = vsel %vm291_vm5, %v289_v46, %v286_v44 }
 0x2c7   :  { %v312_v50 = vsel %vm311_vm6, %v309_v48, %v306_v47 }
 0x2c8   :  { %v314_v51 = vadd.f32 %v312_v50, %v292_v49 }
 0x2ca   :  { %v318_v52 = vsel %vm262_vm2, %v314_v51, 0.0 }
 0x2cb   :  { %319 = vadd.xlane.f32.xlu2 %v318_v52 }
 0x312   :  { %v265_v56 = vpop.xlane.xlu0 %264 }
 0x31a   :  { %v268_v61 = vpop.xlane.xlu1 %267 }
 0x336   :  { %v317_v53 = vpop.xlane.xlu2 %316 }
 0x337   :  { %v321_v54 = vsub.f32 0.0, %v317_v53 }
 0x339   :  { %v355_v55 = vadd.f32 -9.2103405, %v321_v54 }
 0x33b   :  { %v327_v57 = vadd.f32 %v355_v55, %v265_v56 }
 0x33d   :  { %335 = vst.msk [vmem:[%s592_s10] sm:$0xff] %vm334_vm7, %v327_v57 }
 0x33e   :  { %v320_v58 = vpop.xlane.xlu2 %319 }
 0x33f   :  { %v322_v59 = vsub.f32 0.0, %v320_v58 }
 0x341   :  { %v356_v60 = vadd.f32 -9.2103405, %v322_v59 }
 0x343   :  { %v328_v62 = vadd.f32 %v356_v60, %v268_v61 }
 0x345   :  { %336 = vst.msk [vmem:[%s592_s10 + $0x8] sm:$0xff] %vm334_vm7, %v328_v62 }
 0x346   :  { %341 = vsyncpa [#allocation3], 1 }
 0x347   :  { %342 = vsyncpa [#allocation5], 1 }

</bundles_post_ra>
